<compile_context>
chip_gen: v5e
topology: v5e:2x2
jax: 0.10.0
libtpu: 0.0.40
codegen_flags: <defaults>
</compile_context>

<pallas_src>
import functools

import jax
import jax.numpy as jnp
from jax.experimental import pallas as pl
from jax.experimental.pallas import tpu as pltpu

# Native layer widths of SimpleLinear64.
DIMS = [64, 128, 256, 128, 64, 32, 16, 8, 4, 2]
N_LAYERS = len(DIMS) - 1  # 9 linear layers; ReLU after all but the last

# Lane-padded widths: every activation after the input keeps >=128 lanes.
PDIMS = [DIMS[0]] + [max(d, 128) for d in DIMS[1:]]
KPAD = PDIMS[:-1]        # padded fan-in per layer
NPAD = PDIMS[1:]         # padded fan-out per layer
WMAX = max(PDIMS)        # 256: slab extent
OUT_PAD = NPAD[-1]       # 128: padded output width


def mlp_kernel(x_ref, w_ref, b_ref, o_ref):
    """One batch tile through the whole 9-layer MLP.

    x_ref : (TILE_B, 64)   f32   batch tile
    w_ref : (9, 256, 256)  bf16  zero-padded weight slab (VMEM-resident)
    b_ref : (9, 1, 256)    f32   zero-padded bias slab   (VMEM-resident)
    o_ref : (TILE_B, 128)  f32   lane-dense padded output (cols >=2 are zero)
    """
    h = x_ref[...]  # (TILE_B, 64) f32
    for i in range(N_LAYERS):
        kp, npad = KPAD[i], NPAD[i]
        w = w_ref[i][:kp, :npad]     # (kp, npad) bf16, static 128-aligned slice
        b = b_ref[i][:, :npad]       # (1, npad) f32
        # bf16 operands on the MXU, f32 accumulate; bias add / ReLU in f32.
        h = jnp.dot(h.astype(jnp.bfloat16), w,
                    preferred_element_type=jnp.float32) + b
        if i < N_LAYERS - 1:
            h = jnp.maximum(h, 0.0)
    o_ref[...] = h.astype(o_ref.dtype)  # lane-dense (TILE_B, 128) store


def pack_params(weights, biases):
    """Zero-pad each layer to (KPAD, NPAD) and pack into two slabs."""
    w_slab = jnp.zeros((N_LAYERS, WMAX, WMAX), jnp.float32)
    b_slab = jnp.zeros((N_LAYERS, 1, WMAX), jnp.float32)
    for i, (w, b) in enumerate(zip(weights, biases)):
        fi, fo = DIMS[i], DIMS[i + 1]
        w_slab = w_slab.at[i, :fi, :fo].set(w)
        b_slab = b_slab.at[i, 0, :fo].set(b.reshape(fo))
    return w_slab.astype(jnp.bfloat16), b_slab


@functools.partial(jax.jit, static_argnames=("tile_b",))
def simple_linear64(x, weights, biases, *, tile_b=512):
    """x: (B, 64) f32.  weights[i]: (in_i, out_i).  biases[i]: (1, out_i)."""
    batch = x.shape[0]
    tb = min(tile_b, batch)                 # 512-row tiles; small batches use one tile
    grid = (pl.cdiv(batch, tb),)

    w_slab, b_slab = pack_params(weights, biases)

    out_padded = pl.pallas_call(
        mlp_kernel,
        out_shape=jax.ShapeDtypeStruct((batch, OUT_PAD), jnp.float32),
        grid_spec=pltpu.PrefetchScalarGridSpec(
            num_scalar_prefetch=0,
            grid=grid,
            in_specs=[
                # Batch-tiled activations (pipelined HBM<->VMEM).
                pl.BlockSpec((tb, DIMS[0]), lambda i: (i, 0)),
                # Constant index_maps: params DMA'd once, resident across steps.
                pl.BlockSpec((N_LAYERS, WMAX, WMAX), lambda i: (0, 0, 0)),
                pl.BlockSpec((N_LAYERS, 1, WMAX), lambda i: (0, 0, 0)),
            ],
            out_specs=pl.BlockSpec((tb, OUT_PAD), lambda i: (i, 0)),
        ),
        compiler_params=pltpu.CompilerParams(
            # Pure parallel batch axis -> megacore sharding on v7x, no-op on v5e/v6e.
            dimension_semantics=("parallel",)),
    )(x, w_slab, b_slab)

    return out_padded[:, :DIMS[-1]]


def init_params(key):
    """PyTorch nn.Linear-style init: U[-1/sqrt(fan_in), 1/sqrt(fan_in)]."""
    weights, biases = [], []
    for i in range(N_LAYERS):
        fan_in, fan_out = DIMS[i], DIMS[i + 1]
        key, kw, kb = jax.random.split(key, 3)
        bound = 1.0 / jnp.sqrt(fan_in)
        # Stored as (in, out) -- PyTorch's (out, in) transposed.
        w = jax.random.uniform(kw, (fan_in, fan_out), jnp.float32, -bound, bound)
        b = jax.random.uniform(kb, (1, fan_out), jnp.float32, -bound, bound)
        weights.append(w)
        biases.append(b)
    return weights, biases


def reference(x, weights, biases):
    """Pure f32 reference path."""
    h = x
    for i, (w, b) in enumerate(zip(weights, biases)):
        h = h @ w + b
        if i < N_LAYERS - 1:
            h = jnp.maximum(h, 0.0)
    return h


if __name__ == "__main__":
    key = jax.random.PRNGKey(0)
    key, kx = jax.random.split(key)
    x = jax.random.normal(kx, (8, 64), jnp.float32)  # batch=8, features=64

    weights, biases = init_params(key)

    out = simple_linear64(x, weights, biases)
    out = jax.block_until_ready(out)

    ref = reference(x, weights, biases)
    assert out.shape == (8, 2), out.shape
    # Tolerance relaxed for bf16-operand / f32-accumulate matmuls (9 layers).
    assert jnp.allclose(out, ref, atol=5e-2, rtol=5e-2), "mismatch vs reference"

    print("KERNEL_OK")
</pallas_src>

<mosaic_0001>
module attributes {stable_mosaic.version = 11 : i64} {
  func.func @mlp_kernel(%arg0: i32, %arg1: memref<8x64xf32, #tpu.memory_space<vmem>>, %arg2: memref<9x256x256xbf16, #tpu.memory_space<vmem>>, %arg3: memref<9x1x256xf32, #tpu.memory_space<vmem>>, %arg4: memref<8x128xf32, #tpu.memory_space<vmem>>) attributes {dimension_semantics = [#tpu.dimension_semantics<parallel>], iteration_bounds = array<i64: 1>, scalar_prefetch = 0 : i64, scratch_operands = 0 : i64, tpu.core_type = #tpu.core_type<tc>, window_params = [{transform_indices = @transform_0, window_bounds = array<i64: 8, 64>}, {pipeline_mode = #tpu.pipeline_mode<synchronous>, transform_indices = @transform_1, window_bounds = array<i64: 9, 256, 256>}, {pipeline_mode = #tpu.pipeline_mode<synchronous>, transform_indices = @transform_2, window_bounds = array<i64: 9, 1, 256>}, {transform_indices = @transform_3, window_bounds = array<i64: 8, 128>}]} {
    %c0 = arith.constant 0 : index
    %c0_0 = arith.constant 0 : index
    %0 = vector.load %arg1[%c0, %c0_0] : memref<8x64xf32, #tpu.memory_space<vmem>>, vector<8x64xf32>
    %c0_1 = arith.constant 0 : index
    %c0_2 = arith.constant 0 : index
    %c0_3 = arith.constant 0 : index
    %1 = vector.load %arg2[%c0_1, %c0_2, %c0_3] : memref<9x256x256xbf16, #tpu.memory_space<vmem>>, vector<1x256x256xbf16>
    %2 = vector.shape_cast %1 : vector<1x256x256xbf16> to vector<256x256xbf16>
    %3 = vector.extract_strided_slice %2 {offsets = [0, 0], sizes = [64, 128], strides = [1, 1]} : vector<256x256xbf16> to vector<64x128xbf16>
    %c0_4 = arith.constant 0 : index
    %c0_5 = arith.constant 0 : index
    %c0_6 = arith.constant 0 : index
    %4 = vector.load %arg3[%c0_4, %c0_5, %c0_6] : memref<9x1x256xf32, #tpu.memory_space<vmem>>, vector<1x1x256xf32>
    %5 = vector.shape_cast %4 : vector<1x1x256xf32> to vector<1x256xf32>
    %6 = vector.extract_strided_slice %5 {offsets = [0, 0], sizes = [1, 128], strides = [1, 1]} : vector<1x256xf32> to vector<1x128xf32>
    %7 = arith.truncf %0 : vector<8x64xf32> to vector<8x64xbf16>
    %cst = arith.constant dense<0.000000e+00> : vector<8x128xf32>
    %8 = tpu.matmul %7, %3, %cst {dimension_numbers = #tpu.dot_dimension_numbers<[1], [0], [0], [1], [0, 0, 1, 1], [], []>} : vector<8x64xbf16>, vector<64x128xbf16>, vector<8x128xf32> -> vector<8x128xf32>
    %9 = vector.broadcast %6 : vector<1x128xf32> to vector<8x128xf32>
    %10 = arith.addf %8, %9 : vector<8x128xf32>
    %cst_7 = arith.constant 0.000000e+00 : f32
    %11 = vector.broadcast %cst_7 : f32 to vector<8x128xf32>
    %12 = arith.maximumf %10, %11 : vector<8x128xf32>
    %c1 = arith.constant 1 : index
    %c0_8 = arith.constant 0 : index
    %c0_9 = arith.constant 0 : index
    %13 = vector.load %arg2[%c1, %c0_8, %c0_9] : memref<9x256x256xbf16, #tpu.memory_space<vmem>>, vector<1x256x256xbf16>
    %14 = vector.shape_cast %13 : vector<1x256x256xbf16> to vector<256x256xbf16>
    %15 = vector.extract_strided_slice %14 {offsets = [0, 0], sizes = [128, 256], strides = [1, 1]} : vector<256x256xbf16> to vector<128x256xbf16>
    %c1_10 = arith.constant 1 : index
    %c0_11 = arith.constant 0 : index
    %c0_12 = arith.constant 0 : index
    %16 = vector.load %arg3[%c1_10, %c0_11, %c0_12] : memref<9x1x256xf32, #tpu.memory_space<vmem>>, vector<1x1x256xf32>
    %17 = vector.shape_cast %16 : vector<1x1x256xf32> to vector<1x256xf32>
    %18 = arith.truncf %12 : vector<8x128xf32> to vector<8x128xbf16>
    %cst_13 = arith.constant dense<0.000000e+00> : vector<8x256xf32>
    %19 = tpu.matmul %18, %15, %cst_13 {dimension_numbers = #tpu.dot_dimension_numbers<[1], [0], [0], [1], [0, 0, 1, 1], [], []>} : vector<8x128xbf16>, vector<128x256xbf16>, vector<8x256xf32> -> vector<8x256xf32>
    %20 = vector.broadcast %17 : vector<1x256xf32> to vector<8x256xf32>
    %21 = arith.addf %19, %20 : vector<8x256xf32>
    %cst_14 = arith.constant 0.000000e+00 : f32
    %22 = vector.broadcast %cst_14 : f32 to vector<8x256xf32>
    %23 = arith.maximumf %21, %22 : vector<8x256xf32>
    %c2 = arith.constant 2 : index
    %c0_15 = arith.constant 0 : index
    %c0_16 = arith.constant 0 : index
    %24 = vector.load %arg2[%c2, %c0_15, %c0_16] : memref<9x256x256xbf16, #tpu.memory_space<vmem>>, vector<1x256x256xbf16>
    %25 = vector.shape_cast %24 : vector<1x256x256xbf16> to vector<256x256xbf16>
    %26 = vector.extract_strided_slice %25 {offsets = [0, 0], sizes = [256, 128], strides = [1, 1]} : vector<256x256xbf16> to vector<256x128xbf16>
    %c2_17 = arith.constant 2 : index
    %c0_18 = arith.constant 0 : index
    %c0_19 = arith.constant 0 : index
    %27 = vector.load %arg3[%c2_17, %c0_18, %c0_19] : memref<9x1x256xf32, #tpu.memory_space<vmem>>, vector<1x1x256xf32>
    %28 = vector.shape_cast %27 : vector<1x1x256xf32> to vector<1x256xf32>
    %29 = vector.extract_strided_slice %28 {offsets = [0, 0], sizes = [1, 128], strides = [1, 1]} : vector<1x256xf32> to vector<1x128xf32>
    %30 = arith.truncf %23 : vector<8x256xf32> to vector<8x256xbf16>
    %cst_20 = arith.constant dense<0.000000e+00> : vector<8x128xf32>
    %31 = tpu.matmul %30, %26, %cst_20 {dimension_numbers = #tpu.dot_dimension_numbers<[1], [0], [0], [1], [0, 0, 1, 1], [], []>} : vector<8x256xbf16>, vector<256x128xbf16>, vector<8x128xf32> -> vector<8x128xf32>
    %32 = vector.broadcast %29 : vector<1x128xf32> to vector<8x128xf32>
    %33 = arith.addf %31, %32 : vector<8x128xf32>
    %cst_21 = arith.constant 0.000000e+00 : f32
    %34 = vector.broadcast %cst_21 : f32 to vector<8x128xf32>
    %35 = arith.maximumf %33, %34 : vector<8x128xf32>
    %c3 = arith.constant 3 : index
    %c0_22 = arith.constant 0 : index
    %c0_23 = arith.constant 0 : index
    %36 = vector.load %arg2[%c3, %c0_22, %c0_23] : memref<9x256x256xbf16, #tpu.memory_space<vmem>>, vector<1x256x256xbf16>
    %37 = vector.shape_cast %36 : vector<1x256x256xbf16> to vector<256x256xbf16>
    %38 = vector.extract_strided_slice %37 {offsets = [0, 0], sizes = [128, 128], strides = [1, 1]} : vector<256x256xbf16> to vector<128x128xbf16>
    %c3_24 = arith.constant 3 : index
    %c0_25 = arith.constant 0 : index
    %c0_26 = arith.constant 0 : index
    %39 = vector.load %arg3[%c3_24, %c0_25, %c0_26] : memref<9x1x256xf32, #tpu.memory_space<vmem>>, vector<1x1x256xf32>
    %40 = vector.shape_cast %39 : vector<1x1x256xf32> to vector<1x256xf32>
    %41 = vector.extract_strided_slice %40 {offsets = [0, 0], sizes = [1, 128], strides = [1, 1]} : vector<1x256xf32> to vector<1x128xf32>
    %42 = arith.truncf %35 : vector<8x128xf32> to vector<8x128xbf16>
    %cst_27 = arith.constant dense<0.000000e+00> : vector<8x128xf32>
    %43 = tpu.matmul %42, %38, %cst_27 {dimension_numbers = #tpu.dot_dimension_numbers<[1], [0], [0], [1], [0, 0, 1, 1], [], []>} : vector<8x128xbf16>, vector<128x128xbf16>, vector<8x128xf32> -> vector<8x128xf32>
    %44 = vector.broadcast %41 : vector<1x128xf32> to vector<8x128xf32>
    %45 = arith.addf %43, %44 : vector<8x128xf32>
    %cst_28 = arith.constant 0.000000e+00 : f32
    %46 = vector.broadcast %cst_28 : f32 to vector<8x128xf32>
    %47 = arith.maximumf %45, %46 : vector<8x128xf32>
    %c4 = arith.constant 4 : index
    %c0_29 = arith.constant 0 : index
    %c0_30 = arith.constant 0 : index
    %48 = vector.load %arg2[%c4, %c0_29, %c0_30] : memref<9x256x256xbf16, #tpu.memory_space<vmem>>, vector<1x256x256xbf16>
    %49 = vector.shape_cast %48 : vector<1x256x256xbf16> to vector<256x256xbf16>
    %50 = vector.extract_strided_slice %49 {offsets = [0, 0], sizes = [128, 128], strides = [1, 1]} : vector<256x256xbf16> to vector<128x128xbf16>
    %c4_31 = arith.constant 4 : index
    %c0_32 = arith.constant 0 : index
    %c0_33 = arith.constant 0 : index
    %51 = vector.load %arg3[%c4_31, %c0_32, %c0_33] : memref<9x1x256xf32, #tpu.memory_space<vmem>>, vector<1x1x256xf32>
    %52 = vector.shape_cast %51 : vector<1x1x256xf32> to vector<1x256xf32>
    %53 = vector.extract_strided_slice %52 {offsets = [0, 0], sizes = [1, 128], strides = [1, 1]} : vector<1x256xf32> to vector<1x128xf32>
    %54 = arith.truncf %47 : vector<8x128xf32> to vector<8x128xbf16>
    %cst_34 = arith.constant dense<0.000000e+00> : vector<8x128xf32>
    %55 = tpu.matmul %54, %50, %cst_34 {dimension_numbers = #tpu.dot_dimension_numbers<[1], [0], [0], [1], [0, 0, 1, 1], [], []>} : vector<8x128xbf16>, vector<128x128xbf16>, vector<8x128xf32> -> vector<8x128xf32>
    %56 = vector.broadcast %53 : vector<1x128xf32> to vector<8x128xf32>
    %57 = arith.addf %55, %56 : vector<8x128xf32>
    %cst_35 = arith.constant 0.000000e+00 : f32
    %58 = vector.broadcast %cst_35 : f32 to vector<8x128xf32>
    %59 = arith.maximumf %57, %58 : vector<8x128xf32>
    %c5 = arith.constant 5 : index
    %c0_36 = arith.constant 0 : index
    %c0_37 = arith.constant 0 : index
    %60 = vector.load %arg2[%c5, %c0_36, %c0_37] : memref<9x256x256xbf16, #tpu.memory_space<vmem>>, vector<1x256x256xbf16>
    %61 = vector.shape_cast %60 : vector<1x256x256xbf16> to vector<256x256xbf16>
    %62 = vector.extract_strided_slice %61 {offsets = [0, 0], sizes = [128, 128], strides = [1, 1]} : vector<256x256xbf16> to vector<128x128xbf16>
    %c5_38 = arith.constant 5 : index
    %c0_39 = arith.constant 0 : index
    %c0_40 = arith.constant 0 : index
    %63 = vector.load %arg3[%c5_38, %c0_39, %c0_40] : memref<9x1x256xf32, #tpu.memory_space<vmem>>, vector<1x1x256xf32>
    %64 = vector.shape_cast %63 : vector<1x1x256xf32> to vector<1x256xf32>
    %65 = vector.extract_strided_slice %64 {offsets = [0, 0], sizes = [1, 128], strides = [1, 1]} : vector<1x256xf32> to vector<1x128xf32>
    %66 = arith.truncf %59 : vector<8x128xf32> to vector<8x128xbf16>
    %cst_41 = arith.constant dense<0.000000e+00> : vector<8x128xf32>
    %67 = tpu.matmul %66, %62, %cst_41 {dimension_numbers = #tpu.dot_dimension_numbers<[1], [0], [0], [1], [0, 0, 1, 1], [], []>} : vector<8x128xbf16>, vector<128x128xbf16>, vector<8x128xf32> -> vector<8x128xf32>
    %68 = vector.broadcast %65 : vector<1x128xf32> to vector<8x128xf32>
    %69 = arith.addf %67, %68 : vector<8x128xf32>
    %cst_42 = arith.constant 0.000000e+00 : f32
    %70 = vector.broadcast %cst_42 : f32 to vector<8x128xf32>
    %71 = arith.maximumf %69, %70 : vector<8x128xf32>
    %c6 = arith.constant 6 : index
    %c0_43 = arith.constant 0 : index
    %c0_44 = arith.constant 0 : index
    %72 = vector.load %arg2[%c6, %c0_43, %c0_44] : memref<9x256x256xbf16, #tpu.memory_space<vmem>>, vector<1x256x256xbf16>
    %73 = vector.shape_cast %72 : vector<1x256x256xbf16> to vector<256x256xbf16>
    %74 = vector.extract_strided_slice %73 {offsets = [0, 0], sizes = [128, 128], strides = [1, 1]} : vector<256x256xbf16> to vector<128x128xbf16>
    %c6_45 = arith.constant 6 : index
    %c0_46 = arith.constant 0 : index
    %c0_47 = arith.constant 0 : index
    %75 = vector.load %arg3[%c6_45, %c0_46, %c0_47] : memref<9x1x256xf32, #tpu.memory_space<vmem>>, vector<1x1x256xf32>
    %76 = vector.shape_cast %75 : vector<1x1x256xf32> to vector<1x256xf32>
    %77 = vector.extract_strided_slice %76 {offsets = [0, 0], sizes = [1, 128], strides = [1, 1]} : vector<1x256xf32> to vector<1x128xf32>
    %78 = arith.truncf %71 : vector<8x128xf32> to vector<8x128xbf16>
    %cst_48 = arith.constant dense<0.000000e+00> : vector<8x128xf32>
    %79 = tpu.matmul %78, %74, %cst_48 {dimension_numbers = #tpu.dot_dimension_numbers<[1], [0], [0], [1], [0, 0, 1, 1], [], []>} : vector<8x128xbf16>, vector<128x128xbf16>, vector<8x128xf32> -> vector<8x128xf32>
    %80 = vector.broadcast %77 : vector<1x128xf32> to vector<8x128xf32>
    %81 = arith.addf %79, %80 : vector<8x128xf32>
    %cst_49 = arith.constant 0.000000e+00 : f32
    %82 = vector.broadcast %cst_49 : f32 to vector<8x128xf32>
    %83 = arith.maximumf %81, %82 : vector<8x128xf32>
    %c7 = arith.constant 7 : index
    %c0_50 = arith.constant 0 : index
    %c0_51 = arith.constant 0 : index
    %84 = vector.load %arg2[%c7, %c0_50, %c0_51] : memref<9x256x256xbf16, #tpu.memory_space<vmem>>, vector<1x256x256xbf16>
    %85 = vector.shape_cast %84 : vector<1x256x256xbf16> to vector<256x256xbf16>
    %86 = vector.extract_strided_slice %85 {offsets = [0, 0], sizes = [128, 128], strides = [1, 1]} : vector<256x256xbf16> to vector<128x128xbf16>
    %c7_52 = arith.constant 7 : index
    %c0_53 = arith.constant 0 : index
    %c0_54 = arith.constant 0 : index
    %87 = vector.load %arg3[%c7_52, %c0_53, %c0_54] : memref<9x1x256xf32, #tpu.memory_space<vmem>>, vector<1x1x256xf32>
    %88 = vector.shape_cast %87 : vector<1x1x256xf32> to vector<1x256xf32>
    %89 = vector.extract_strided_slice %88 {offsets = [0, 0], sizes = [1, 128], strides = [1, 1]} : vector<1x256xf32> to vector<1x128xf32>
    %90 = arith.truncf %83 : vector<8x128xf32> to vector<8x128xbf16>
    %cst_55 = arith.constant dense<0.000000e+00> : vector<8x128xf32>
    %91 = tpu.matmul %90, %86, %cst_55 {dimension_numbers = #tpu.dot_dimension_numbers<[1], [0], [0], [1], [0, 0, 1, 1], [], []>} : vector<8x128xbf16>, vector<128x128xbf16>, vector<8x128xf32> -> vector<8x128xf32>
    %92 = vector.broadcast %89 : vector<1x128xf32> to vector<8x128xf32>
    %93 = arith.addf %91, %92 : vector<8x128xf32>
    %cst_56 = arith.constant 0.000000e+00 : f32
    %94 = vector.broadcast %cst_56 : f32 to vector<8x128xf32>
    %95 = arith.maximumf %93, %94 : vector<8x128xf32>
    %c8 = arith.constant 8 : index
    %c0_57 = arith.constant 0 : index
    %c0_58 = arith.constant 0 : index
    %96 = vector.load %arg2[%c8, %c0_57, %c0_58] : memref<9x256x256xbf16, #tpu.memory_space<vmem>>, vector<1x256x256xbf16>
    %97 = vector.shape_cast %96 : vector<1x256x256xbf16> to vector<256x256xbf16>
    %98 = vector.extract_strided_slice %97 {offsets = [0, 0], sizes = [128, 128], strides = [1, 1]} : vector<256x256xbf16> to vector<128x128xbf16>
    %c8_59 = arith.constant 8 : index
    %c0_60 = arith.constant 0 : index
    %c0_61 = arith.constant 0 : index
    %99 = vector.load %arg3[%c8_59, %c0_60, %c0_61] : memref<9x1x256xf32, #tpu.memory_space<vmem>>, vector<1x1x256xf32>
    %100 = vector.shape_cast %99 : vector<1x1x256xf32> to vector<1x256xf32>
    %101 = vector.extract_strided_slice %100 {offsets = [0, 0], sizes = [1, 128], strides = [1, 1]} : vector<1x256xf32> to vector<1x128xf32>
    %102 = arith.truncf %95 : vector<8x128xf32> to vector<8x128xbf16>
    %cst_62 = arith.constant dense<0.000000e+00> : vector<8x128xf32>
    %103 = tpu.matmul %102, %98, %cst_62 {dimension_numbers = #tpu.dot_dimension_numbers<[1], [0], [0], [1], [0, 0, 1, 1], [], []>} : vector<8x128xbf16>, vector<128x128xbf16>, vector<8x128xf32> -> vector<8x128xf32>
    %104 = vector.broadcast %101 : vector<1x128xf32> to vector<8x128xf32>
    %105 = arith.addf %103, %104 : vector<8x128xf32>
    %c0_63 = arith.constant 0 : index
    %c0_64 = arith.constant 0 : index
    %106 = vector.load %arg4[%c0_63, %c0_64] : memref<8x128xf32, #tpu.memory_space<vmem>>, vector<8x128xf32>
    tpu.vector_store %arg4[%c0_63, %c0_64], %105 {strides = array<i32>} : memref<8x128xf32, #tpu.memory_space<vmem>>, vector<8x128xf32>,
    return
  }
  func.func @transform_0(%arg0: i32) -> (i32, i32) {
    %c0_i32 = arith.constant 0 : i32
    %c0_i32_0 = arith.constant 0 : i32
    return %arg0, %c0_i32 : i32, i32
  }
  func.func @transform_1(%arg0: i32) -> (i32, i32, i32) {
    %c0_i32 = arith.constant 0 : i32
    %c0_i32_0 = arith.constant 0 : i32
    %c0_i32_1 = arith.constant 0 : i32
    %c0_i32_2 = arith.constant 0 : i32
    return %c0_i32, %c0_i32_0, %c0_i32_1 : i32, i32, i32
  }
  func.func @transform_2(%arg0: i32) -> (i32, i32, i32) {
    %c0_i32 = arith.constant 0 : i32
    %c0_i32_0 = arith.constant 0 : i32
    %c0_i32_1 = arith.constant 0 : i32
    %c0_i32_2 = arith.constant 0 : i32
    return %c0_i32, %c0_i32_0, %c0_i32_1 : i32, i32, i32
  }
  func.func @transform_3(%arg0: i32) -> (i32, i32) {
    %c0_i32 = arith.constant 0 : i32
    %c0_i32_0 = arith.constant 0 : i32
    return %arg0, %c0_i32 : i32, i32
  }
}

</mosaic_0001>

<bundles_post_ra>
// kernel: simple_linear64.1
= control target key start
LH: loop header
LB: loop body
LE: loop exit
PB: predicated region body
PF: predicated region fallthrough
CT: control target
= control target key end

     0   :  { %vm53_vm0 = vcmask 523264   ;;  %s2011_s1 = inlined_call_operand.vmem [shape: bf16[9,256,256], index: 1, kind: input, shape index: {}]   ;;  %s2012_s0 = inlined_call_operand.vmem [shape: f32[8,64], index: 0, kind: input, shape index: {}]   ;;  %s2013_s2 = inlined_call_operand.vmem [shape: f32[9,1,256], index: 2, kind: input, shape index: {}]   ;;  %s2014_s3 = inlined_call_operand.vmem [shape: f32[8,128], index: 3, kind: output, shape index: {}]  }
   0x1   :  { %v895_v0 = vld [vmem:[%s2011_s1 + $0x30] sm:$0xf]  ;;  %v1373_v1 = vld [vmem:[%s2011_s1 + $0x34] sm:$0xf0]  ;;  %v891_v2 = vld [vmem:[%s2011_s1 + $0x20] sm:$0xf] }
   0x2   :  { %v896_v3 = vor.u32 %v1373_v1, %v895_v0  ;;  %v1372_v4 = vld [vmem:[%s2011_s1 + $0x24] sm:$0xf0]  ;;  %v887_v5 = vld [vmem:[%s2011_s1 + $0x10] sm:$0xf]  ;;  %v1371_v6 = vld [vmem:[%s2011_s1 + $0x14] sm:$0xf0] }
   0x3   :  { %v892_v7 = vor.u32 %v1372_v4, %v891_v2  ;;  %v973_v8 = vld [vmem:[%s2011_s1 + $0x170] sm:$0xf]  ;;  %v1389_v9 = vld [vmem:[%s2011_s1 + $0x174] sm:$0xf0]  ;;  %v1388_v10 = vld [vmem:[%s2011_s1 + $0x174] sm:$0xf]  ;;  %v888_v19 = vor.u32 %v1371_v6, %v887_v5 }
   0x4   :  { %61 = vmatpush.bf16.msra.mxu0 %v896_v3  ;;  %v974_v11 = vor.u32 %v1389_v9, %v973_v8  ;;  %v975_v12 = vld [vmem:[%s2011_s1 + $0x178] sm:$0xf0]  ;;  %v965_v13 = vld [vmem:[%s2011_s1 + $0x160] sm:$0xf]  ;;  %v1387_v14 = vld [vmem:[%s2011_s1 + $0x164] sm:$0xf0] }
   0x5   :  { %v978_v15 = vor.u32 %v1388_v10, %v975_v12  ;;  %v1386_v16 = vld [vmem:[%s2011_s1 + $0x164] sm:$0xf]  ;;  %v967_v17 = vld [vmem:[%s2011_s1 + $0x168] sm:$0xf0]  ;;  %v966_v18 = vor.u32 %v1387_v14, %v965_v13  ;;  %v883_v20 = vld [vmem:[%s2011_s1] sm:$0xf] }
   0x6   :  { %176 = vmatpush.bf16.msra.mxu1 %v974_v11  ;;  %v970_v21 = vor.u32 %v1386_v16, %v967_v17  ;;  %v957_v22 = vld [vmem:[%s2011_s1 + $0x150] sm:$0xf]  ;;  %v1385_v23 = vld [vmem:[%s2011_s1 + $0x154] sm:$0xf0]  ;;  %v1370_v24 = vld [vmem:[%s2011_s1 + $0x4] sm:$0xf0] }
   0x7   :  { %189 = vmatpush.bf16.msra.mxu2 %v978_v15  ;;  %v1384_v25 = vld [vmem:[%s2011_s1 + $0x154] sm:$0xf]  ;;  %v959_v26 = vld [vmem:[%s2011_s1 + $0x158] sm:$0xf0]  ;;  %v958_v27 = vor.u32 %v1385_v23, %v957_v22  ;;  %v884_v28 = vor.u32 %v1370_v24, %v883_v20  ;;  %v15_v29 = vld [vmem:[%s2012_s0] sm:$0xff] }
   0x8   :  { %62 = vmatpush.bf16.msra.mxu0 %v892_v7  ;;  %v962_v30 = vor.u32 %v1384_v25, %v959_v26  ;;  %v949_v31 = vld [vmem:[%s2011_s1 + $0x140] sm:$0xf]  ;;  %v1383_v32 = vld [vmem:[%s2011_s1 + $0x144] sm:$0xf0]  ;;  %v1382_v33 = vld [vmem:[%s2011_s1 + $0x144] sm:$0xf]  ;;  %v25_v35 = vpack.c.bf16 %v15_v29, %v15_v29 }
   0x9   :  { %v951_v34 = vld [vmem:[%s2011_s1 + $0x148] sm:$0xf0]  ;;  %v950_v36 = vor.u32 %v1383_v32, %v949_v31  ;;  %v941_v38 = vld [vmem:[%s2011_s1 + $0x130] sm:$0xf]  ;;  %v1381_v39 = vld [vmem:[%s2011_s1 + $0x134] sm:$0xf0] }
   0xa   :  { %177 = vmatpush.bf16.msra.mxu1 %v966_v18  ;;  %v954_v37 = vor.u32 %v1382_v33, %v951_v34  ;;  %v1380_v40 = vld [vmem:[%s2011_s1 + $0x134] sm:$0xf]  ;;  %v943_v41 = vld [vmem:[%s2011_s1 + $0x138] sm:$0xf0]  ;;  %v942_v42 = vor.u32 %v1381_v39, %v941_v38  ;;  %v933_v44 = vld [vmem:[%s2011_s1 + $0x120] sm:$0xf] }
   0xb   :  { %190 = vmatpush.bf16.msra.mxu2 %v970_v21  ;;  %v946_v43 = vor.u32 %v1380_v40, %v943_v41  ;;  %v1379_v45 = vld [vmem:[%s2011_s1 + $0x124] sm:$0xf0]  ;;  %v1378_v46 = vld [vmem:[%s2011_s1 + $0x124] sm:$0xf]  ;;  %v935_v47 = vld [vmem:[%s2011_s1 + $0x128] sm:$0xf0] }
   0xc   :  { %63 = vmatpush.bf16.msra.mxu0 %v888_v19  ;;  %v934_v48 = vor.u32 %v1379_v45, %v933_v44  ;;  %v938_v49 = vor.u32 %v1378_v46, %v935_v47  ;;  %v925_v50 = vld [vmem:[%s2011_s1 + $0x110] sm:$0xf]  ;;  %v1377_v51 = vld [vmem:[%s2011_s1 + $0x114] sm:$0xf0]  ;;  %v1376_v52 = vld [vmem:[%s2011_s1 + $0x114] sm:$0xf] }
   0xd   :  { %v926_v53 = vor.u32 %v1377_v51, %v925_v50  ;;  %v927_v54 = vld [vmem:[%s2011_s1 + $0x118] sm:$0xf0]  ;;  %v917_v56 = vld [vmem:[%s2011_s1 + $0x100] sm:$0xf]  ;;  %v1375_v57 = vld [vmem:[%s2011_s1 + $0x104] sm:$0xf0] }
   0xe   :  { %178 = vmatpush.bf16.msra.mxu1 %v958_v27  ;;  %v930_v55 = vor.u32 %v1376_v52, %v927_v54  ;;  %v1374_v58 = vld [vmem:[%s2011_s1 + $0x104] sm:$0xf]  ;;  %v918_v59 = vor.u32 %v1375_v57, %v917_v56  ;;  %v919_v60 = vld [vmem:[%s2011_s1 + $0x108] sm:$0xf0]  ;;  %v1042_v62 = vld [vmem:[%s2011_s1 + $0x270] sm:$0xf] }
   0xf   :  { %191 = vmatpush.bf16.msra.mxu2 %v962_v30  ;;  %v922_v61 = vor.u32 %v1374_v58, %v919_v60  ;;  %v1397_v63 = vld [vmem:[%s2011_s1 + $0x274] sm:$0xf0]  ;;  %v1038_v0 = vld [vmem:[%s2011_s1 + $0x260] sm:$0xf]  ;;  %v1396_v2 = vld [vmem:[%s2011_s1 + $0x264] sm:$0xf0] }
  0x10   :  { %64 = vmatpush.bf16.msra.mxu0 %v884_v28  ;;  %v1043_v1 = vor.u32 %v1397_v63, %v1042_v62  ;;  %v1074_v3 = vld [vmem:[%s2011_s1 + $0x2f0] sm:$0xf]  ;;  %v1405_v4 = vld [vmem:[%s2011_s1 + $0x2f4] sm:$0xf0]  ;;  %v1070_v6 = vld [vmem:[%s2011_s1 + $0x2e0] sm:$0xf]  ;;  %v1039_v7 = vor.u32 %v1396_v2, %v1038_v0 }
  0x11   :  { %v1075_v5 = vor.u32 %v1405_v4, %v1074_v3  ;;  %v1404_v8 = vld [vmem:[%s2011_s1 + $0x2e4] sm:$0xf0]  ;;  %v1034_v9 = vld [vmem:[%s2011_s1 + $0x250] sm:$0xf]  ;;  %v1395_v10 = vld [vmem:[%s2011_s1 + $0x254] sm:$0xf0] }
  0x12   :  { %179 = vmatpush.bf16.msra.mxu1 %v950_v36  ;;  %340 = vmatpush.bf16.msra.mxu3 %v1043_v1  ;;  %v1071_v11 = vor.u32 %v1404_v8, %v1070_v6  ;;  %v1066_v12 = vld [vmem:[%s2011_s1 + $0x2d0] sm:$0xf]  ;;  %v1403_v13 = vld [vmem:[%s2011_s1 + $0x2d4] sm:$0xf0]  ;;  %v1035_v14 = vor.u32 %v1395_v10, %v1034_v9  ;;  %v1030_v15 = vld [vmem:[%s2011_s1 + $0x240] sm:$0xf] }
  0x13   :  { %897 = vmatmul.msk.bf16.vlgmr.msra.gmra.mxu0 %vm53_vm0, %v25_v35  ;;  %192 = vmatpush.bf16.msra.mxu2 %v954_v37  ;;  %v1394_v16 = vld [vmem:[%s2011_s1 + $0x244] sm:$0xf0]  ;;  %v1067_v17 = vor.u32 %v1403_v13, %v1066_v12  ;;  %v1062_v18 = vld [vmem:[%s2011_s1 + $0x2c0] sm:$0xf]  ;;  %v1026_v21 = vld [vmem:[%s2011_s1 + $0x230] sm:$0xf] }
  0x14   :  { %353 = vmatpush.bf16.msrb.mxu0 %v1075_v5  ;;  %v1402_v19 = vld [vmem:[%s2011_s1 + $0x2c4] sm:$0xf0]  ;;  %v1031_v20 = vor.u32 %v1394_v16, %v1030_v15  ;;  %v1393_v22 = vld [vmem:[%s2011_s1 + $0x234] sm:$0xf0]  ;;  %v1058_v24 = vld [vmem:[%s2011_s1 + $0x2b0] sm:$0xf] }
  0x15   :  { %v1063_v23 = vor.u32 %v1402_v19, %v1062_v18  ;;  %v1401_v25 = vld [vmem:[%s2011_s1 + $0x2b4] sm:$0xf0]  ;;  %v1027_v26 = vor.u32 %v1393_v22, %v1026_v21  ;;  %v1022_v27 = vld [vmem:[%s2011_s1 + $0x220] sm:$0xf]  ;;  %v1392_v28 = vld [vmem:[%s2011_s1 + $0x224] sm:$0xf0] }
  0x16   :  { %180 = vmatpush.bf16.msra.mxu1 %v942_v42  ;;  %341 = vmatpush.bf16.msra.mxu3 %v1039_v7  ;;  %v1059_v29 = vor.u32 %v1401_v25, %v1058_v24  ;;  %v24_v30 = vld [vmem:[%s2013_s2] sm:$0x3]  ;;  %v1023_v31 = vor.u32 %v1392_v28, %v1022_v27  ;;  %v1018_v38 = vld [vmem:[%s2011_s1 + $0x210] sm:$0xf]  ;;  %v1391_v39 = vld [vmem:[%s2011_s1 + $0x214] sm:$0xf0] }
  0x17   :  { %193 = vmatpush.bf16.msra.mxu2 %v946_v43  ;;  %v27_v32 = vperm.slane %v24_v30, 0  ;;  %v1019_v40 = vor.u32 %v1391_v39, %v1018_v38  ;;  %v1054_v41 = vld [vmem:[%s2011_s1 + $0x2a0] sm:$0xf]  ;;  %v1400_v42 = vld [vmem:[%s2011_s1 + $0x2a4] sm:$0xf0] }
  0x18   :  { %354 = vmatpush.bf16.msrb.mxu0 %v1071_v11  ;;  %v1055_v43 = vor.u32 %v1400_v42, %v1054_v41  ;;  %v1014_v44 = vld [vmem:[%s2011_s1 + $0x200] sm:$0xf]  ;;  %v1390_v45 = vld [vmem:[%s2011_s1 + $0x204] sm:$0xf0]  ;;  %v1050_v47 = vld [vmem:[%s2011_s1 + $0x290] sm:$0xf] }
  0x19   :  { %v1015_v46 = vor.u32 %v1390_v45, %v1014_v44  ;;  %v1046_v50 = vld [vmem:[%s2011_s1 + $0x280] sm:$0xf]  ;;  %v1398_v51 = vld [vmem:[%s2011_s1 + $0x284] sm:$0xf0]  ;;  %v1413_v54 = vld [vmem:[%s2011_s1 + $0x374] sm:$0xf0] }
  0x1a   :  { %181 = vmatpush.bf16.msra.mxu1 %v934_v48  ;;  %342 = vmatpush.bf16.msra.mxu3 %v1035_v14  ;;  %v1399_v48 = vld [vmem:[%s2011_s1 + $0x294] sm:$0xf0]  ;;  %v1047_v52 = vor.u32 %v1398_v51, %v1046_v50  ;;  %v1412_v57 = vld [vmem:[%s2011_s1 + $0x364] sm:$0xf0]  ;;  %v1111_v62 = vld [vmem:[%s2011_s1 + $0x340] sm:$0xf] }
  0x1b   :  { %194 = vmatpush.bf16.msra.mxu2 %v938_v49  ;;  %v1051_v49 = vor.u32 %v1399_v48, %v1050_v47  ;;  %v1411_v60 = vld [vmem:[%s2011_s1 + $0x354] sm:$0xf0]  ;;  %v1410_v63 = vld [vmem:[%s2011_s1 + $0x344] sm:$0xf0]  ;;  %v914_v1 = vld [vmem:[%s2013_s2 + $0x2] sm:$0x3] }
  0x1c   :  { %355 = vmatpush.bf16.msrb.mxu0 %v1067_v17  ;;  %v1112_v0 = vor.u32 %v1410_v63, %v1111_v62  ;;  %v1107_v2 = vld [vmem:[%s2011_s1 + $0x330] sm:$0xf]  ;;  %v1409_v3 = vld [vmem:[%s2011_s1 + $0x334] sm:$0xf0]  ;;  %v92_v4 = vperm.slane %v914_v1, 0  ;;  %v93_v12 = vperm.slane %v914_v1, 1 }
  0x1d   :  { %v1108_v5 = vor.u32 %v1409_v3, %v1107_v2  ;;  %v1103_v6 = vld [vmem:[%s2011_s1 + $0x320] sm:$0xf]  ;;  %v1408_v7 = vld [vmem:[%s2011_s1 + $0x324] sm:$0xf0]  ;;  %v1407_v21 = vld [vmem:[%s2011_s1 + $0x314] sm:$0xf0] }
  0x1e   :  { %182 = vmatpush.bf16.msra.mxu1 %v926_v53  ;;  %343 = vmatpush.bf16.msra.mxu3 %v1031_v20  ;;  %v1123_v53 = vld [vmem:[%s2011_s1 + $0x370] sm:$0xf]  ;;  %v1104_v10 = vor.u32 %v1408_v7, %v1103_v6  ;;  %v1406_v24 = vld [vmem:[%s2011_s1 + $0x304] sm:$0xf0]  ;;  %v1421_v27 = vld [vmem:[%s2011_s1 + $0x474] sm:$0xf0] }
  0x1f   :  { %195 = vmatpush.bf16.msra.mxu2 %v930_v55  ;;  %v1119_v55 = vld [vmem:[%s2011_s1 + $0x360] sm:$0xf]  ;;  %v1124_v56 = vor.u32 %v1413_v54, %v1123_v53  ;;  %v1099_v20 = vld [vmem:[%s2011_s1 + $0x310] sm:$0xf]  ;;  %v1420_v30 = vld [vmem:[%s2011_s1 + $0x464] sm:$0xf0] }
  0x20   :  { %356 = vmatpush.bf16.msrb.mxu0 %v1063_v23  ;;  %v1120_v58 = vor.u32 %v1412_v57, %v1119_v55  ;;  %v1100_v22 = vor.u32 %v1407_v21, %v1099_v20  ;;  %v1095_v23 = vld [vmem:[%s2011_s1 + $0x300] sm:$0xf]  ;;  %v1156_v38 = vld [vmem:[%s2011_s1 + $0x430] sm:$0xf]  ;;  %v1417_v39 = vld [vmem:[%s2011_s1 + $0x434] sm:$0xf0] }
  0x21   :  { %v1096_v25 = vor.u32 %v1406_v24, %v1095_v23  ;;  %v1168_v28 = vld [vmem:[%s2011_s1 + $0x460] sm:$0xf]  ;;  %v1416_v42 = vld [vmem:[%s2011_s1 + $0x424] sm:$0xf0]  ;;  %v1148_v54 = vld [vmem:[%s2011_s1 + $0x410] sm:$0xf] }
  0x22   :  { %183 = vmatpush.bf16.msra.mxu1 %v918_v59  ;;  %344 = vmatpush.bf16.msra.mxu3 %v1027_v26  ;;  %v1115_v59 = vld [vmem:[%s2011_s1 + $0x350] sm:$0xf]  ;;  %v1152_v41 = vld [vmem:[%s2011_s1 + $0x420] sm:$0xf]  ;;  %v1415_v55 = vld [vmem:[%s2011_s1 + $0x414] sm:$0xf0] }
  0x23   :  { %196 = vmatpush.bf16.msra.mxu2 %v922_v61  ;;  %v1116_v61 = vor.u32 %v1411_v60, %v1115_v59  ;;  %v1172_v26 = vld [vmem:[%s2011_s1 + $0x470] sm:$0xf]  ;;  %v1153_v44 = vor.u32 %v1416_v42, %v1152_v41  ;;  %v1144_v57 = vld [vmem:[%s2011_s1 + $0x400] sm:$0xf]  ;;  %v1427_v3 = vld [vmem:[%s2011_s1 + $0x554] sm:$0xf0] }
  0x24   :  { %357 = vmatpush.bf16.msrb.mxu0 %v1059_v29  ;;  %v1173_v29 = vor.u32 %v1421_v27, %v1172_v26  ;;  %v1221_v60 = vld [vmem:[%s2011_s1 + $0x570] sm:$0xf]  ;;  %v1217_v62 = vld [vmem:[%s2011_s1 + $0x560] sm:$0xf]  ;;  %v1426_v6 = vld [vmem:[%s2011_s1 + $0x544] sm:$0xf0] }
  0x25   :  { %v1213_v2 = vld [vmem:[%s2011_s1 + $0x550] sm:$0xf]  ;;  %v1193_v24 = vld [vmem:[%s2011_s1 + $0x500] sm:$0xf] }
  0x26   :  { %345 = vmatpush.bf16.msra.mxu3 %v1023_v31  ;;  %438 = vmatpush.bf16.msrb.mxu1 %v1124_v56  ;;  %v1169_v31 = vor.u32 %v1420_v30, %v1168_v28  ;;  %v1149_v56 = vor.u32 %v1415_v55, %v1148_v54  ;;  %v1197_v21 = vld [vmem:[%s2011_s1 + $0x510] sm:$0xf]  ;;  %v1437_v28 = vld [vmem:[%s2011_s1 + $0x674] sm:$0xf0]  ;;  %v1250_v42 = vld [vmem:[%s2011_s1 + $0x620] sm:$0xf] }
  0x27   :  { %523 = vmatpush.bf16.msrb.mxu2 %v1173_v29  ;;  %v1270_v27 = vld [vmem:[%s2011_s1 + $0x670] sm:$0xf]  ;;  %v1266_v29 = vld [vmem:[%s2011_s1 + $0x660] sm:$0xf] }
  0x28   :  { %358 = vmatpush.bf16.msrb.mxu0 %v1055_v43  ;;  %v1011_v43 = vld [vmem:[%s2013_s2 + $0x4] sm:$0x3]  ;;  %v1271_v30 = vor.u32 %v1437_v28, %v1270_v27  ;;  %v1242_v55 = vld [vmem:[%s2011_s1 + $0x600] sm:$0xf] }
  0x29   :  { %v242_v45 = vperm.slane %v1011_v43, 0  ;;  %v1432_v43 = vld [vmem:[%s2011_s1 + $0x624] sm:$0xf0]  ;;  %v1364_v27 = vld [vmem:[%s2011_s1 + $0x860] sm:$0xf] }
  0x2a   :  { %346 = vmatpush.bf16.msra.mxu3 %v1019_v40  ;;  %439 = vmatpush.bf16.msrb.mxu1 %v1120_v58  ;;  %v1157_v40 = vor.u32 %v1417_v39, %v1156_v38  ;;  %v1414_v58 = vld [vmem:[%s2011_s1 + $0x404] sm:$0xf0]  ;;  %v1254_v39 = vld [vmem:[%s2011_s1 + $0x630] sm:$0xf] }
  0x2b   :  { %524 = vmatpush.bf16.msrb.mxu2 %v1169_v31  ;;  %v1145_v59 = vor.u32 %v1414_v58, %v1144_v57  ;;  %v1436_v31 = vld [vmem:[%s2011_s1 + $0x664] sm:$0xf0]  ;;  %v1319_v58 = vld [vmem:[%s2011_s1 + $0x770] sm:$0xf] }
  0x2c   :  { %359 = vmatpush.bf16.msrb.mxu0 %v1051_v49 }
  0x2e   :  { %347 = vmatpush.bf16.msra.mxu3 %v1015_v46  ;;  %440 = vmatpush.bf16.msrb.mxu1 %v1116_v61  ;;  %v1429_v61 = vld [vmem:[%s2011_s1 + $0x574] sm:$0xf0] }
  0x2f   :  { %v1222_v63 = vor.u32 %v1429_v61, %v1221_v60  ;;  %v1315_v60 = vld [vmem:[%s2011_s1 + $0x760] sm:$0xf] }
  0x30   :  { %360 = vmatpush.bf16.msrb.mxu0 %v1047_v52 }
  0x32   :  { %441 = vmatpush.bf16.msrb.mxu1 %v1112_v0  ;;  %v1428_v0 = vld [vmem:[%s2011_s1 + $0x564] sm:$0xf0]  ;;  %608 = vmatpush.bf16.msrb.mxu3 %v1222_v63 }
  0x33   :  { %v1218_v1 = vor.u32 %v1428_v0, %v1217_v62  ;;  %v1444_v62 = vld [vmem:[%s2011_s1 + $0x764] sm:$0xf0]  ;;  %v1311_v0 = vld [vmem:[%s2011_s1 + $0x750] sm:$0xf] }
  0x34   :  { %693 = vmatpush.bf16.msra.mxu0 %v1271_v30  ;;  %v1316_v63 = vor.u32 %v1444_v62, %v1315_v60 }
  0x36   :  { %442 = vmatpush.bf16.msrb.mxu1 %v1108_v5  ;;  %609 = vmatpush.bf16.msrb.mxu3 %v1218_v1  ;;  %v1209_v5 = vld [vmem:[%s2011_s1 + $0x540] sm:$0xf]  ;;  %v1443_v1 = vld [vmem:[%s2011_s1 + $0x754] sm:$0xf0] }
  0x37   :  { %v1210_v7 = vor.u32 %v1426_v6, %v1209_v5  ;;  %v1303_v6 = vld [vmem:[%s2011_s1 + $0x730] sm:$0xf] }
  0x3a   :  { %443 = vmatpush.bf16.msrb.mxu1 %v1104_v10 }
  0x3e   :  { %444 = vmatpush.bf16.msrb.mxu1 %v1100_v22  ;;  %v1423_v22 = vld [vmem:[%s2011_s1 + $0x514] sm:$0xf0] }
  0x3f   :  { %v1198_v23 = vor.u32 %v1423_v22, %v1197_v21  ;;  %v1291_v22 = vld [vmem:[%s2011_s1 + $0x700] sm:$0xf] }
  0x42   :  { %445 = vmatpush.bf16.msrb.mxu1 %v1096_v25  ;;  %v1422_v25 = vld [vmem:[%s2011_s1 + $0x504] sm:$0xf0] }
  0x43   :  { %v1194_v26 = vor.u32 %v1422_v25, %v1193_v24  ;;  %v1368_v25 = vld [vmem:[%s2011_s1 + $0x870] sm:$0xf] }
  0x90   :  { %v66_v33 = vpop.f32.mrf.mxu0 }
  0x91   :  { %v67_v34 = vadd.f32 %v66_v33, %v27_v32  ;;  %v1164_v32 = vld [vmem:[%s2011_s1 + $0x450] sm:$0xf]  ;;  %v1419_v33 = vld [vmem:[%s2011_s1 + $0x454] sm:$0xf0] }
  0x93   :  { %v70_v35 = vmax.f32 %v67_v34, 0.0  ;;  %v1165_v34 = vor.u32 %v1419_v33, %v1164_v32  ;;  %v1267_v32 = vor.u32 %v1436_v31, %v1266_v29  ;;  %v1262_v33 = vld [vmem:[%s2011_s1 + $0x650] sm:$0xf]  ;;  %v1452_v29 = vld [vmem:[%s2011_s1 + $0x864] sm:$0xf0] }
  0x94   :  { %v1365_v30 = vor.u32 %v1452_v29, %v1364_v27  ;;  %v1360_v31 = vld [vmem:[%s2011_s1 + $0x850] sm:$0xf] }
  0x95   :  { %v90_v36 = vpack.c.bf16 %v70_v35, %v70_v35  ;;  %v1160_v35 = vld [vmem:[%s2011_s1 + $0x440] sm:$0xf]  ;;  %525 = vmatpush.bf16.msrb.mxu2 %v1165_v34  ;;  %v1435_v34 = vld [vmem:[%s2011_s1 + $0x654] sm:$0xf0]  ;;  %694 = vmatpush.bf16.msra.mxu0 %v1267_v32 }
  0x96   :  { %v1451_v32 = vld [vmem:[%s2011_s1 + $0x854] sm:$0xf0] }
  0x97   :  { %184 = vmatmul.bf16.vlgmr.msra.gmra.mxu1 %v90_v36  ;;  %197 = vmatmul.bf16.vlgmr.msra.gmra.mxu2 %v90_v36  ;;  %v1418_v36 = vld [vmem:[%s2011_s1 + $0x444] sm:$0xf0] }
  0x98   :  { %v68_v37 = vpop.f32.mrf.mxu0 }
  0x99   :  { %v1161_v37 = vor.u32 %v1418_v36, %v1160_v35  ;;  %v1263_v35 = vor.u32 %v1435_v34, %v1262_v33  ;;  %v1258_v36 = vld [vmem:[%s2011_s1 + $0x640] sm:$0xf]  ;;  %v1361_v33 = vor.u32 %v1451_v32, %v1360_v31 }
  0x9a   :  { %v1356_v34 = vld [vmem:[%s2011_s1 + $0x840] sm:$0xf] }
  0x9b   :  { %526 = vmatpush.bf16.msrb.mxu2 %v1161_v37  ;;  %v1434_v37 = vld [vmem:[%s2011_s1 + $0x644] sm:$0xf0]  ;;  %695 = vmatpush.bf16.msra.mxu0 %v1263_v35 }
  0x9c   :  { %v1259_v38 = vor.u32 %v1434_v37, %v1258_v36  ;;  %v1450_v35 = vld [vmem:[%s2011_s1 + $0x844] sm:$0xf0]  ;;  %v1352_v37 = vld [vmem:[%s2011_s1 + $0x830] sm:$0xf] }
  0x9d   :  { %v1357_v36 = vor.u32 %v1450_v35, %v1356_v34 }
  0x9f   :  { %527 = vmatpush.bf16.msrb.mxu2 %v1157_v40  ;;  %v1433_v40 = vld [vmem:[%s2011_s1 + $0x634] sm:$0xf0]  ;;  %696 = vmatpush.bf16.msra.mxu0 %v1259_v38 }
  0xa0   :  { %v1255_v41 = vor.u32 %v1433_v40, %v1254_v39  ;;  %v1449_v38 = vld [vmem:[%s2011_s1 + $0x834] sm:$0xf0]  ;;  %v1348_v40 = vld [vmem:[%s2011_s1 + $0x820] sm:$0xf] }
  0xa1   :  { %v1353_v39 = vor.u32 %v1449_v38, %v1352_v37 }
  0xa3   :  { %528 = vmatpush.bf16.msrb.mxu2 %v1153_v44  ;;  %v1141_v44 = vld [vmem:[%s2013_s2 + $0x8] sm:$0x3]  ;;  %697 = vmatpush.bf16.msra.mxu0 %v1255_v41 }
  0xa4   :  { %v1448_v41 = vld [vmem:[%s2011_s1 + $0x824] sm:$0xf0] }
  0xa7   :  { %529 = vmatpush.bf16.msrb.mxu2 %v1149_v56  ;;  %v1430_v56 = vld [vmem:[%s2011_s1 + $0x604] sm:$0xf0] }
  0xa8   :  { %v1243_v57 = vor.u32 %v1430_v56, %v1242_v55  ;;  %v1288_v56 = vld [vmem:[%s2013_s2 + $0xe] sm:$0x3] }
  0xab   :  { %530 = vmatpush.bf16.msrb.mxu2 %v1145_v59  ;;  %v1445_v59 = vld [vmem:[%s2011_s1 + $0x774] sm:$0xf0] }
  0xac   :  { %v1320_v61 = vor.u32 %v1445_v59, %v1319_v58 }
  0xae   :  { %778 = vmatpush.bf16.msra.mxu1 %v1320_v61 }
  0xb2   :  { %779 = vmatpush.bf16.msra.mxu1 %v1316_v63  ;;  %v1337_v63 = vld [vmem:[%s2013_s2 + $0x10] sm:$0x3] }
 0x114   :  { %v185_v8 = vpop.f32.mrf.mxu1 }
 0x115   :  { %v186_v9 = vadd.f32 %v185_v8, %v92_v4  ;;  %v1214_v4 = vor.u32 %v1427_v3, %v1213_v2  ;;  %v1205_v8 = vld [vmem:[%s2011_s1 + $0x530] sm:$0xf]  ;;  %v1312_v2 = vor.u32 %v1443_v1, %v1311_v0  ;;  %v1307_v3 = vld [vmem:[%s2011_s1 + $0x740] sm:$0xf]  ;;  %v813_v0 = vperm.slane %v1337_v63, 0 }
 0x117   :  { %v202_v11 = vmax.f32 %v186_v9, 0.0  ;;  %610 = vmatpush.bf16.msrb.mxu3 %v1214_v4  ;;  %v1425_v9 = vld [vmem:[%s2011_s1 + $0x534] sm:$0xf0]  ;;  %v1442_v4 = vld [vmem:[%s2011_s1 + $0x744] sm:$0xf0]  ;;  %780 = vmatpush.bf16.msra.mxu1 %v1312_v2 }
 0x118   :  { %v1206_v10 = vor.u32 %v1425_v9, %v1205_v8  ;;  %v1308_v5 = vor.u32 %v1442_v4, %v1307_v3  ;;  %v1299_v9 = vld [vmem:[%s2011_s1 + $0x720] sm:$0xf] }
 0x119   :  { %v239_v13 = vpack.c.bf16 %v202_v11, %v202_v11  ;;  %v1201_v11 = vld [vmem:[%s2011_s1 + $0x520] sm:$0xf] }
 0x11a   :  { %v198_v14 = vpop.f32.mrf.mxu2 }
 0x11b   :  { %v199_v15 = vadd.f32 %v198_v14, %v93_v12  ;;  %348 = vmatmul.bf16.vlgmr.msra.gmra.mxu3 %v239_v13  ;;  %v1424_v12 = vld [vmem:[%s2011_s1 + $0x524] sm:$0xf0]  ;;  %v1092_v13 = vld [vmem:[%s2013_s2 + $0x6] sm:$0x3]  ;;  %781 = vmatpush.bf16.msra.mxu1 %v1308_v5 }
 0x11c   :  { %v187_v16 = vpop.f32.mrf.mxu1  ;;  %611 = vmatpush.bf16.msrb.mxu3 %v1210_v7  ;;  %v1202_v14 = vor.u32 %v1424_v12, %v1201_v11  ;;  %v1441_v7 = vld [vmem:[%s2011_s1 + $0x734] sm:$0xf0]  ;;  %v1190_v11 = vld [vmem:[%s2013_s2 + $0xa] sm:$0x3] }
 0x11d   :  { %v203_v17 = vmax.f32 %v199_v15, 0.0  ;;  %v388_v15 = vperm.slane %v1092_v13, 0  ;;  %v1304_v8 = vor.u32 %v1441_v7, %v1303_v6  ;;  %v558_v13 = vperm.slane %v1190_v11, 0 }
 0x11f   :  { %v240_v18 = vpack.c.bf16 %v203_v17, %v203_v17  ;;  %782 = vmatpush.bf16.msra.mxu1 %v1304_v8 }
 0x120   :  { %612 = vmatpush.bf16.msrb.mxu3 %v1206_v10  ;;  %v1440_v10 = vld [vmem:[%s2011_s1 + $0x724] sm:$0xf0] }
 0x121   :  { %361 = vmatmul.bf16.vlgmr.msrb.gmra.mxu0 %v240_v18  ;;  %v1300_v12 = vor.u32 %v1440_v10, %v1299_v9 }
 0x122   :  { %v200_v19 = vpop.f32.mrf.mxu2 }
 0x123   :  { %783 = vmatpush.bf16.msra.mxu1 %v1300_v12 }
 0x124   :  { %613 = vmatpush.bf16.msrb.mxu3 %v1202_v14 }
 0x128   :  { %614 = vmatpush.bf16.msrb.mxu3 %v1198_v23  ;;  %v1438_v23 = vld [vmem:[%s2011_s1 + $0x704] sm:$0xf0] }
 0x129   :  { %v1292_v24 = vor.u32 %v1438_v23, %v1291_v22 }
 0x12c   :  { %615 = vmatpush.bf16.msrb.mxu3 %v1194_v26  ;;  %v1453_v26 = vld [vmem:[%s2011_s1 + $0x874] sm:$0xf0] }
 0x12d   :  { %v1369_v28 = vor.u32 %v1453_v26, %v1368_v25 }
 0x12f   :  { %863 = vmatpush.bf16.msra.mxu2 %v1369_v28 }
 0x133   :  { %864 = vmatpush.bf16.msra.mxu2 %v1365_v30 }
 0x137   :  { %865 = vmatpush.bf16.msra.mxu2 %v1361_v33 }
 0x13b   :  { %866 = vmatpush.bf16.msra.mxu2 %v1357_v36 }
 0x13f   :  { %867 = vmatpush.bf16.msra.mxu2 %v1353_v39 }
 0x19e   :  { %v349_v46 = vpop.f32.mrf.mxu3  ;;  %v362_v47 = vpop.f32.mrf.mxu0 }
 0x19f   :  { %v350_v48 = vadd.f32 %v349_v46, %v242_v45  ;;  %v1251_v45 = vor.u32 %v1432_v43, %v1250_v42  ;;  %v473_v46 = vperm.slane %v1141_v44, 0  ;;  %v1239_v42 = vld [vmem:[%s2013_s2 + $0xc] sm:$0x3]  ;;  %v1349_v43 = vor.u32 %v1448_v41, %v1348_v40 }
 0x1a0   :  { %v643_v44 = vperm.slane %v1239_v42, 0 }
 0x1a1   :  { %v363_v49 = vadd.f32 %v362_v47, %v350_v48  ;;  %698 = vmatpush.bf16.msra.mxu0 %v1251_v45  ;;  %868 = vmatpush.bf16.msra.mxu2 %v1349_v43 }
 0x1a3   :  { %v366_v50 = vmax.f32 %v363_v49, 0.0 }
 0x1a5   :  { %v386_v51 = vpack.c.bf16 %v366_v50, %v366_v50 }
 0x1a6   :  { %v351_v52 = vpop.f32.mrf.mxu3  ;;  %v364_v53 = vpop.f32.mrf.mxu0 }
 0x1a7   :  { %446 = vmatmul.bf16.vlgmr.msrb.gmra.mxu1 %v386_v51  ;;  %v1246_v52 = vld [vmem:[%s2011_s1 + $0x610] sm:$0xf]  ;;  %v1431_v53 = vld [vmem:[%s2011_s1 + $0x614] sm:$0xf0] }
 0x1a8   :  { %v1247_v54 = vor.u32 %v1431_v53, %v1246_v52  ;;  %v1340_v53 = vld [vmem:[%s2011_s1 + $0x800] sm:$0xf] }
 0x1aa   :  { %699 = vmatpush.bf16.msra.mxu0 %v1247_v54  ;;  %v1446_v54 = vld [vmem:[%s2011_s1 + $0x804] sm:$0xf0] }
 0x1ab   :  { %v1341_v55 = vor.u32 %v1446_v54, %v1340_v53 }
 0x1ae   :  { %700 = vmatpush.bf16.msra.mxu0 %v1243_v57  ;;  %v728_v57 = vperm.slane %v1288_v56, 0 }
 0x224   :  { %v447_v16 = vpop.f32.mrf.mxu1 }
 0x225   :  { %v448_v17 = vadd.f32 %v447_v16, %v388_v15 }
 0x227   :  { %v451_v18 = vmax.f32 %v448_v17, 0.0 }
 0x229   :  { %v471_v19 = vpack.c.bf16 %v451_v18, %v451_v18 }
 0x22b   :  { %531 = vmatmul.bf16.vlgmr.msrb.gmra.mxu2 %v471_v19  ;;  %v1295_v19 = vld [vmem:[%s2011_s1 + $0x710] sm:$0xf] }
 0x22c   :  { %v449_v20 = vpop.f32.mrf.mxu1 }
 0x22d   :  { %v1439_v20 = vld [vmem:[%s2011_s1 + $0x714] sm:$0xf0] }
 0x22e   :  { %v1296_v21 = vor.u32 %v1439_v20, %v1295_v19 }
 0x230   :  { %784 = vmatpush.bf16.msra.mxu1 %v1296_v21 }
 0x234   :  { %785 = vmatpush.bf16.msra.mxu1 %v1292_v24 }
 0x2ae   :  { %v532_v47 = vpop.f32.mrf.mxu2 }
 0x2af   :  { %v533_v48 = vadd.f32 %v532_v47, %v473_v46 }
 0x2b1   :  { %v536_v49 = vmax.f32 %v533_v48, 0.0 }
 0x2b3   :  { %v556_v50 = vpack.c.bf16 %v536_v49, %v536_v49 }
 0x2b5   :  { %616 = vmatmul.bf16.vlgmr.msrb.gmra.mxu3 %v556_v50  ;;  %v1344_v50 = vld [vmem:[%s2011_s1 + $0x810] sm:$0xf] }
 0x2b6   :  { %v534_v51 = vpop.f32.mrf.mxu2 }
 0x2b7   :  { %v1447_v51 = vld [vmem:[%s2011_s1 + $0x814] sm:$0xf0] }
 0x2b8   :  { %v1345_v52 = vor.u32 %v1447_v51, %v1344_v50 }
 0x2ba   :  { %869 = vmatpush.bf16.msra.mxu2 %v1345_v52 }
 0x2be   :  { %870 = vmatpush.bf16.msra.mxu2 %v1341_v55 }
 0x338   :  { %v617_v14 = vpop.f32.mrf.mxu3 }
 0x339   :  { %v618_v15 = vadd.f32 %v617_v14, %v558_v13 }
 0x33b   :  { %v621_v16 = vmax.f32 %v618_v15, 0.0 }
 0x33d   :  { %v641_v17 = vpack.c.bf16 %v621_v16, %v621_v16 }
 0x33f   :  { %701 = vmatmul.bf16.vlgmr.msra.gmra.mxu0 %v641_v17 }
 0x340   :  { %v619_v18 = vpop.f32.mrf.mxu3 }
 0x3bc   :  { %v702_v45 = vpop.f32.mrf.mxu0 }
 0x3bd   :  { %v703_v46 = vadd.f32 %v702_v45, %v643_v44 }
 0x3bf   :  { %v706_v47 = vmax.f32 %v703_v46, 0.0 }
 0x3c1   :  { %v726_v48 = vpack.c.bf16 %v706_v47, %v706_v47 }
 0x3c3   :  { %786 = vmatmul.bf16.vlgmr.msra.gmra.mxu1 %v726_v48 }
 0x3c4   :  { %v704_v49 = vpop.f32.mrf.mxu0 }
 0x440   :  { %v787_v58 = vpop.f32.mrf.mxu1 }
 0x441   :  { %v788_v59 = vadd.f32 %v787_v58, %v728_v57 }
 0x443   :  { %v791_v60 = vmax.f32 %v788_v59, 0.0 }
 0x445   :  { %v811_v61 = vpack.c.bf16 %v791_v60, %v791_v60 }
 0x447   :  { %871 = vmatmul.bf16.vlgmr.msra.gmra.mxu2 %v811_v61 }
 0x448   :  { %v789_v62 = vpop.f32.mrf.mxu1 }
 0x4ca   :  { %v872_v1 = vpop.f32.mrf.mxu2 }
 0x4cb   :  { %v873_v2 = vadd.f32 %v872_v1, %v813_v0 }
 0x4cd   :  { %876 = vst [vmem:[%s2014_s3] sm:$0xff] %v873_v2 }
 0x4d2   :  { %v874_v3 = vpop.f32.mrf.mxu2 }

</bundles_post_ra>
